<compile_context>
chip_gen: v5e
topology: v5e:2x2
jax: 0.10.0
libtpu: 0.0.40
codegen_flags: <defaults>
</compile_context>

<pallas_src>
import math
import functools

import jax
import jax.numpy as jnp
from jax.experimental import pallas as pl
from jax.experimental.pallas import tpu as pltpu


def _round_up(v, m):
    return ((v + m - 1) // m) * m


def _stable_softplus(x):
    # log(1 + exp(x)) without f32 overflow (exp argument is always <= 0).
    return jnp.maximum(x, 0.0) + jnp.log(1.0 + jnp.exp(-jnp.abs(x)))


def _tpu_defaults():
    """Generation-aware (tn, tc, vmem_limit) keyed off physical VMEM capacity."""
    vmem_cap = 128 * 1024 * 1024
    try:
        vmem_cap = int(pltpu.get_tpu_info().vmem_capacity_bytes)
    except Exception:
        pass
    if vmem_cap >= 100 * 1024 * 1024:
        # v5e / v6e class (128 MiB VMEM): large tn amortizes the streamed weight.
        return 768, 512, 96 * 1024 * 1024
    # v7x class (64 MiB VMEM per TensorCore): smaller tiles, tighter VMEM cap.
    return 512, 256, min(48 * 1024 * 1024, (vmem_cap * 3) // 4)


def _sphereface2_kernel(x_ref, w_ref, label_ref, bias_ref,        # inputs
                        loss_ref, correct_ref,                    # outputs
                        max_oth, cos_tgt,                         # VMEM scratch
                        *, scale, margin, lanbuda, t,
                        num_valid_classes, num_padded_classes):
    ci = pl.program_id(1)

    @pl.when(ci == 0)
    def _init():
        loss_ref[...] = jnp.zeros_like(loss_ref)          # resident across ci
        max_oth[...] = jnp.full_like(max_oth, -jnp.inf)   # max over non-target scores
        cos_tgt[...] = jnp.zeros_like(cos_tgt)            # cos at target class

    x = x_ref[...]                      # (tn, d)   bf16 (pre-normalized)
    w = w_ref[...]                      # (d, tc)   bf16 (pre-normalized, transposed)
    label = label_ref[...]              # (tn, 1)   int32
    bias = bias_ref[0, 0]               # f32 scalar from SMEM

    tc = w.shape[1]

    # cos(theta) tile on the MXU, f32 accumulation.
    cos = jax.lax.dot_general(x, w, (((1,), (0,)), ((), ())),
                              preferred_element_type=jnp.float32)   # (tn, tc)

    # fun_g folded:  scale*(g + margin) + bias = 2*scale*h^t + const
    h = cos * 0.5 + 0.5
    ht = jax.lax.integer_pow(h, t)                                  # VPU multiplies
    z_n = (2.0 * scale) * ht + (scale * (margin - 1.0) + bias)
    sp_n = _stable_softplus(z_n)

    # Class bookkeeping from a (1, tc) lane iota (not a (tn, tc) tensor).
    iota_c = jax.lax.broadcasted_iota(jnp.int32, (1, tc), 1)
    label_loc = label - ci * tc                                     # (tn, 1)
    tmask = iota_c == label_loc                                     # (tn, tc) one-hot (at most)

    # Non-target loss term, (1-lanbuda) applied once to the row sum.
    loss_ref[...] += (1.0 - lanbuda) * jnp.sum(sp_n, axis=1, keepdims=True)

    # Gather cos at the target class (appears in exactly one C tile per row).
    cos_tgt[...] += jnp.sum(jnp.where(tmask, cos, 0.0), axis=1, keepdims=True)

    # Running max of non-target (and non-padded) scores for the accuracy test.
    if num_valid_classes != num_padded_classes:     # static python check
        invalid = iota_c >= (num_valid_classes - ci * tc)           # (1, tc)
        excl = jnp.logical_or(tmask, invalid)
    else:
        excl = tmask
    scores = jnp.where(excl, -jnp.inf, cos)
    max_oth[...] = jnp.maximum(max_oth[...],
                               jnp.max(scores, axis=1, keepdims=True))

    @pl.when(ci == pl.num_programs(1) - 1)
    def _finalize():
        # Per-row target correction (only 2 softplus per row, not per (N, C)):
        #   + lanbuda*softplus(-(scale*(g_t - m) + b))
        #   - (1-lanbuda)*softplus(scale*(g_t + m) + b)   (undo non-target term)
        c_t = cos_tgt[...]
        h_t = c_t * 0.5 + 0.5
        g_t = 2.0 * jax.lax.integer_pow(h_t, t) - 1.0
        sp_p = _stable_softplus(-(scale * (g_t - margin) + bias))
        sp_nt = _stable_softplus(scale * (g_t + margin) + bias)
        loss_ref[...] += lanbuda * sp_p - (1.0 - lanbuda) * sp_nt
        # Top-1 correct <=> (cos_tgt - margin) beats every other class score.
        correct_ref[...] = ((c_t - margin) >= max_oth[...]).astype(jnp.float32)


def sphereface2_loss(x, label, weight, bias,
                     scale=32.0, margin=0.2, lanbuda=0.7, t=3,
                     tn=None, tc=None, mxu_dtype=jnp.bfloat16, w_buffers=2):
    """x: (B, S, D) f32, label: (B,) int, weight: (C, D) f32, bias: (1, 1) f32.

    Returns (loss, top-1 accuracy %), matching the 'C' margin_type forward.
    """
    # TODO(synk): only the 'C' margin_type path is implemented (module default);
    # the 'A' branch (cos(theta+m), sin/th/mm terms) is not ported.
    assert x.ndim == 3
    b, s, d = x.shape
    n = b * s
    c = weight.shape[0]

    tn_def, tc_def, vmem_limit = _tpu_defaults()
    tn = tn_def if tn is None else int(tn)
    tc = tc_def if tc is None else int(tc)

    # --- host-side pre-layout (hoisted normalization, transposed weight) ---
    x2 = x.reshape(n, d).astype(jnp.float32)
    x_n = x2 / jnp.maximum(jnp.sqrt(jnp.sum(x2 * x2, axis=1, keepdims=True)), 1e-12)
    w32 = weight.astype(jnp.float32)
    w_n = w32 / jnp.maximum(jnp.sqrt(jnp.sum(w32 * w32, axis=1, keepdims=True)), 1e-12)
    w_nT = w_n.T                                                    # (D, C), C lane-dense

    lab = jnp.repeat(label.astype(jnp.int32), s).reshape(n, 1)

    # --- tiling (aligned, clamped; >=2 N-tiles when rows allow, for megacore) ---
    n_align, c_align = 32, 128
    tn = max(n_align, min(tn, _round_up(n, n_align)))
    if n <= tn and n > n_align:
        tn = _round_up((n + 1) // 2, n_align)
    tc = max(c_align, min(tc, _round_up(c, c_align)))
    n_pad = _round_up(n, tn)
    c_pad = _round_up(c, tc)

    if n_pad != n:
        x_n = jnp.pad(x_n, ((0, n_pad - n), (0, 0)))
        lab = jnp.pad(lab, ((0, n_pad - n), (0, 0)))
    if c_pad != c:
        w_nT = jnp.pad(w_nT, ((0, 0), (0, c_pad - c)))   # zero cols -> cos == 0 exactly

    x_in = x_n.astype(mxu_dtype)
    w_in = w_nT.astype(mxu_dtype)
    bias_in = jnp.asarray(bias, jnp.float32).reshape(1, 1)

    grid = (n_pad // tn, c_pad // tc)

    kernel = functools.partial(
        _sphereface2_kernel,
        scale=float(scale), margin=float(margin), lanbuda=float(lanbuda),
        t=int(t), num_valid_classes=int(c), num_padded_classes=int(c_pad))

    # Weight is the only streamed operand; optionally deepen its pipeline.
    w_spec_kwargs = {}
    if int(w_buffers) > 2:
        w_spec_kwargs["pipeline_mode"] = pl.Buffered(int(w_buffers))
    w_spec = pl.BlockSpec((d, tc), lambda ni, ci: (0, ci), **w_spec_kwargs)

    itemsize = jnp.dtype(mxu_dtype).itemsize
    cost = pl.CostEstimate(
        flops=2 * n_pad * c_pad * d + 15 * n_pad * c_pad,
        transcendentals=2 * n_pad * c_pad + 4 * n_pad,
        bytes_accessed=(n_pad * d * itemsize
                        + grid[0] * d * c_pad * itemsize   # weight re-streamed per N-tile
                        + n_pad * 4 + 4 + 2 * n_pad * 4),
    )

    loss_rows, correct = pl.pallas_call(
        kernel,
        grid_spec=pltpu.PrefetchScalarGridSpec(
            num_scalar_prefetch=0,
            grid=grid,
            in_specs=[
                pl.BlockSpec((tn, d), lambda ni, ci: (ni, 0)),      # x_n (bf16)
                w_spec,                                             # w_n^T (bf16)
                pl.BlockSpec((tn, 1), lambda ni, ci: (ni, 0)),      # labels
                pl.BlockSpec(memory_space=pltpu.MemorySpace.SMEM),  # bias scalar
            ],
            out_specs=(
                pl.BlockSpec((tn, 1), lambda ni, ci: (ni, 0)),      # per-row loss (accumulator)
                pl.BlockSpec((tn, 1), lambda ni, ci: (ni, 0)),      # per-row correct
            ),
            scratch_shapes=[
                pltpu.VMEM((tn, 1), jnp.float32),   # running max of non-target scores
                pltpu.VMEM((tn, 1), jnp.float32),   # cos at target class
            ],
        ),
        out_shape=(
            jax.ShapeDtypeStruct((n_pad, 1), jnp.float32),
            jax.ShapeDtypeStruct((n_pad, 1), jnp.float32),
        ),
        compiler_params=pltpu.CompilerParams(
            dimension_semantics=("parallel", "arbitrary"),
            vmem_limit_bytes=int(vmem_limit),
        ),
        cost_estimate=cost,
    )(x_in, w_in, lab, bias_in)

    loss_sum = jnp.sum(loss_rows[:n, 0])
    if c_pad != c:
        # Padded weight columns give cos == 0 exactly, so each contributes the same
        # constant softplus to every row's non-target sum; remove it analytically.
        bias_s = bias_in[0, 0]
        z_pad = 2.0 * scale * (0.5 ** t) + (scale * (margin - 1.0) + bias_s)
        loss_sum = loss_sum - (n * (c_pad - c) * (1.0 - lanbuda)) * _stable_softplus(z_pad)
    loss = loss_sum / n
    prec1 = 100.0 * jnp.sum(correct[:n, 0]) / n
    return loss, prec1


def _reference_loss(x, label, weight, bias, scale, margin, lanbuda, t):
    """Pure-JAX f32 reference mirroring the PyTorch 'C' forward."""
    b, s, d = x.shape
    n = b * s
    c = weight.shape[0]
    lab = jnp.repeat(label.astype(jnp.int32), s)
    x2 = x.reshape(n, d).astype(jnp.float32)
    x_n = x2 / jnp.maximum(jnp.sqrt(jnp.sum(x2 * x2, axis=1, keepdims=True)), 1e-12)
    w_n = weight / jnp.maximum(jnp.sqrt(jnp.sum(weight * weight, axis=1, keepdims=True)), 1e-12)
    cos = x_n @ w_n.T
    g = 2.0 * ((cos + 1.0) * 0.5) ** t - 1.0
    bias_s = jnp.asarray(bias, jnp.float32).reshape(())
    zp = scale * (g - margin) + bias_s
    zn = scale * (g + margin) + bias_s
    cos_p = lanbuda * jnp.log(1.0 + jnp.exp(-zp))
    cos_n = (1.0 - lanbuda) * jnp.log(1.0 + jnp.exp(zn))
    tmask = jax.nn.one_hot(lab, c, dtype=jnp.float32)
    loss = jnp.mean(jnp.sum(tmask * cos_p + (1.0 - tmask) * cos_n, axis=1))
    out = scale * ((cos - margin) * tmask + cos * (1.0 - tmask))
    pred = jnp.argmax(out, axis=1)
    prec1 = 100.0 * jnp.mean((pred == lab).astype(jnp.float32))
    return loss, prec1


if __name__ == "__main__":
    # Small shapes consistent with the module's forward (x is 3-D).
    # Exercises: 2 N-tiles (megacore clamp), class padding (200 -> 256), row padding.
    B, S, D, C = 2, 24, 32, 200   # N = 48 rows, 200 classes

    key = jax.random.PRNGKey(0)
    kx, kw, kl = jax.random.split(key, 3)

    x = jax.random.normal(kx, (B, S, D), dtype=jnp.float32)
    label = jax.random.randint(kl, (B,), 0, C, dtype=jnp.int32)

    # nn.init.xavier_uniform_ on weight (C, D): U(-a, a), a = sqrt(6/(C+D))
    bound = math.sqrt(6.0 / (C + D))
    weight = jax.random.uniform(kw, (C, D), dtype=jnp.float32,
                                minval=-bound, maxval=bound)
    bias = jnp.zeros((1, 1), dtype=jnp.float32)

    loss, prec1 = sphereface2_loss(x, label, weight, bias,
                                   scale=32.0, margin=0.2, lanbuda=0.7, t=3)
    jax.block_until_ready((loss, prec1))

    ref_loss, ref_prec1 = _reference_loss(x, label, weight, bias, 32.0, 0.2, 0.7, 3)

    assert bool(jnp.isfinite(loss)), "non-finite loss"
    assert 0.0 <= float(prec1) <= 100.0, "accuracy out of range"
    # bf16 MXU operands -> loose tolerance vs the f32 reference.
    assert abs(float(loss) - float(ref_loss)) <= 0.05 * max(1.0, abs(float(ref_loss))), \
        (float(loss), float(ref_loss))
    assert abs(float(prec1) - float(ref_prec1)) <= 2.0 * 100.0 / (B * S) + 1e-3, \
        (float(prec1), float(ref_prec1))
    print("KERNEL_OK")
</pallas_src>

<mosaic_0001>
module attributes {stable_mosaic.version = 11 : i64} {
  func.func @_sphereface2_kernel(%arg0: i32, %arg1: i32, %arg2: memref<32x32xbf16, #tpu.memory_space<vmem>>, %arg3: memref<32x256xbf16, #tpu.memory_space<vmem>>, %arg4: memref<32x1xi32, #tpu.memory_space<vmem>>, %arg5: memref<1x1xf32, #tpu.memory_space<smem>>, %arg6: memref<32x1xf32, #tpu.memory_space<vmem>>, %arg7: memref<32x1xf32, #tpu.memory_space<vmem>>, %arg8: memref<32x1xf32, #tpu.memory_space<vmem>>, %arg9: memref<32x1xf32, #tpu.memory_space<vmem>>) attributes {dimension_semantics = [#tpu.dimension_semantics<parallel>, #tpu.dimension_semantics<arbitrary>], iteration_bounds = array<i64: 2, 1>, scalar_prefetch = 0 : i64, scratch_operands = 2 : i64, tpu.core_type = #tpu.core_type<tc>, window_params = [{transform_indices = @transform_0, window_bounds = array<i64: 32, 32>}, {transform_indices = @transform_1, window_bounds = array<i64: 32, 256>}, {transform_indices = @transform_2, window_bounds = array<i64: 32, 1>}, {transform_indices = @transform_3, window_bounds = array<i64: 1, 1>}, {transform_indices = @transform_4, window_bounds = array<i64: 32, 1>}, {transform_indices = @transform_5, window_bounds = array<i64: 32, 1>}]} {
    %c0_i32 = arith.constant 0 : i32
    %0 = arith.cmpi eq, %arg1, %c0_i32 : i32
    %1 = arith.extui %0 : i1 to i32
    %c0_i32_0 = arith.constant 0 : i32
    %2 = arith.cmpi ne, %1, %c0_i32_0 : i32
    scf.if %2 {
      %cst_36 = arith.constant 0.000000e+00 : f32
      %66 = vector.broadcast %cst_36 : f32 to vector<32x1xf32>
      %c0_37 = arith.constant 0 : index
      %c0_38 = arith.constant 0 : index
      %67 = vector.load %arg6[%c0_37, %c0_38] : memref<32x1xf32, #tpu.memory_space<vmem>>, vector<32x1xf32>
      tpu.vector_store %arg6[%c0_37, %c0_38], %66 {strides = array<i32>} : memref<32x1xf32, #tpu.memory_space<vmem>>, vector<32x1xf32>,
      %cst_39 = arith.constant 0xFF800000 : f32
      %68 = vector.broadcast %cst_39 : f32 to vector<32x1xf32>
      %c0_40 = arith.constant 0 : index
      %c0_41 = arith.constant 0 : index
      %69 = vector.load %arg8[%c0_40, %c0_41] : memref<32x1xf32, #tpu.memory_space<vmem>>, vector<32x1xf32>
      tpu.vector_store %arg8[%c0_40, %c0_41], %68 {strides = array<i32>} : memref<32x1xf32, #tpu.memory_space<vmem>>, vector<32x1xf32>,
      %cst_42 = arith.constant 0.000000e+00 : f32
      %70 = vector.broadcast %cst_42 : f32 to vector<32x1xf32>
      %c0_43 = arith.constant 0 : index
      %c0_44 = arith.constant 0 : index
      %71 = vector.load %arg9[%c0_43, %c0_44] : memref<32x1xf32, #tpu.memory_space<vmem>>, vector<32x1xf32>
      tpu.vector_store %arg9[%c0_43, %c0_44], %70 {strides = array<i32>} : memref<32x1xf32, #tpu.memory_space<vmem>>, vector<32x1xf32>,
    } else {
    }
    %c0 = arith.constant 0 : index
    %c0_1 = arith.constant 0 : index
    %3 = vector.load %arg2[%c0, %c0_1] : memref<32x32xbf16, #tpu.memory_space<vmem>>, vector<32x32xbf16>
    %c0_2 = arith.constant 0 : index
    %c0_3 = arith.constant 0 : index
    %4 = vector.load %arg3[%c0_2, %c0_3] : memref<32x256xbf16, #tpu.memory_space<vmem>>, vector<32x256xbf16>
    %c0_4 = arith.constant 0 : index
    %c0_5 = arith.constant 0 : index
    %5 = vector.load %arg4[%c0_4, %c0_5] : memref<32x1xi32, #tpu.memory_space<vmem>>, vector<32x1xi32>
    %c0_6 = arith.constant 0 : index
    %c0_7 = arith.constant 0 : index
    %6 = memref.load %arg5[%c0_6, %c0_7] : memref<1x1xf32, #tpu.memory_space<smem>>
    %cst = arith.constant dense<0.000000e+00> : vector<32x256xf32>
    %7 = tpu.matmul %3, %4, %cst {dimension_numbers = #tpu.dot_dimension_numbers<[1], [0], [0], [1], [0, 0, 1, 1], [], []>} : vector<32x32xbf16>, vector<32x256xbf16>, vector<32x256xf32> -> vector<32x256xf32>
    %cst_8 = arith.constant 5.000000e-01 : f32
    %8 = vector.broadcast %cst_8 : f32 to vector<32x256xf32>
    %9 = arith.mulf %7, %8 : vector<32x256xf32>
    %cst_9 = arith.constant 5.000000e-01 : f32
    %10 = vector.broadcast %cst_9 : f32 to vector<32x256xf32>
    %11 = arith.addf %9, %10 : vector<32x256xf32>
    %12 = arith.mulf %11, %11 : vector<32x256xf32>
    %13 = arith.mulf %11, %12 : vector<32x256xf32>
    %cst_10 = arith.constant 6.400000e+01 : f32
    %14 = vector.broadcast %cst_10 : f32 to vector<32x256xf32>
    %15 = arith.mulf %14, %13 : vector<32x256xf32>
    %cst_11 = arith.constant -2.560000e+01 : f32
    %16 = arith.addf %cst_11, %6 : f32
    %17 = vector.broadcast %16 : f32 to vector<32x256xf32>
    %18 = arith.addf %15, %17 : vector<32x256xf32>
    %cst_12 = arith.constant 0.000000e+00 : f32
    %19 = vector.broadcast %cst_12 : f32 to vector<32x256xf32>
    %20 = arith.maximumf %18, %19 : vector<32x256xf32>
    %21 = math.absf %18 : vector<32x256xf32>
    %cst_13 = arith.constant 0.000000e+00 : f32
    %22 = vector.broadcast %cst_13 : f32 to vector<32x256xf32>
    %23 = arith.subf %22, %21 : vector<32x256xf32>
    %24 = math.exp %23 : vector<32x256xf32>
    %cst_14 = arith.constant 1.000000e+00 : f32
    %25 = vector.broadcast %cst_14 : f32 to vector<32x256xf32>
    %26 = arith.addf %25, %24 : vector<32x256xf32>
    %27 = math.log %26 : vector<32x256xf32>
    %28 = arith.addf %20, %27 : vector<32x256xf32>
    %29 = tpu.iota {dimensions = array<i32: 1>} : vector<1x256xi32>
    %c256_i32 = arith.constant 256 : i32
    %30 = arith.muli %arg1, %c256_i32 : i32
    %31 = vector.broadcast %30 : i32 to vector<32x1xi32>
    %32 = arith.subi %5, %31 : vector<32x1xi32>
    %33 = vector.broadcast %29 : vector<1x256xi32> to vector<32x256xi32>
    %34 = vector.broadcast %32 : vector<32x1xi32> to vector<32x256xi32>
    %35 = arith.cmpi eq, %33, %34 : vector<32x256xi32>
    %c0_15 = arith.constant 0 : index
    %c0_16 = arith.constant 0 : index
    %36 = vector.load %arg6[%c0_15, %c0_16] : memref<32x1xf32, #tpu.memory_space<vmem>>, vector<32x1xf32>
    %cst_17 = arith.constant dense<0.000000e+00> : vector<32xf32>
    %37 = vector.multi_reduction <add>, %28, %cst_17 [1] : vector<32x256xf32> to vector<32xf32>
    %38 = vector.shape_cast %37 : vector<32xf32> to vector<32x1xf32>
    %cst_18 = arith.constant 3.000000e-01 : f32
    %39 = vector.broadcast %cst_18 : f32 to vector<32x1xf32>
    %40 = arith.mulf %39, %38 : vector<32x1xf32>
    %41 = arith.addf %36, %40 : vector<32x1xf32>
    %c0_19 = arith.constant 0 : index
    %c0_20 = arith.constant 0 : index
    %42 = vector.load %arg6[%c0_19, %c0_20] : memref<32x1xf32, #tpu.memory_space<vmem>>, vector<32x1xf32>
    tpu.vector_store %arg6[%c0_19, %c0_20], %41 {strides = array<i32>} : memref<32x1xf32, #tpu.memory_space<vmem>>, vector<32x1xf32>,
    %c0_21 = arith.constant 0 : index
    %c0_22 = arith.constant 0 : index
    %43 = vector.load %arg9[%c0_21, %c0_22] : memref<32x1xf32, #tpu.memory_space<vmem>>, vector<32x1xf32>
    %cst_23 = arith.constant 0.000000e+00 : f32
    %44 = vector.broadcast %cst_23 : f32 to vector<32x256xf32>
    %45 = arith.select %35, %7, %44 : vector<32x256xi1>, vector<32x256xf32>
    %cst_24 = arith.constant dense<0.000000e+00> : vector<32xf32>
    %46 = vector.multi_reduction <add>, %45, %cst_24 [1] : vector<32x256xf32> to vector<32xf32>
    %47 = vector.shape_cast %46 : vector<32xf32> to vector<32x1xf32>
    %48 = arith.addf %43, %47 : vector<32x1xf32>
    %c0_25 = arith.constant 0 : index
    %c0_26 = arith.constant 0 : index
    %49 = vector.load %arg9[%c0_25, %c0_26] : memref<32x1xf32, #tpu.memory_space<vmem>>, vector<32x1xf32>
    tpu.vector_store %arg9[%c0_25, %c0_26], %48 {strides = array<i32>} : memref<32x1xf32, #tpu.memory_space<vmem>>, vector<32x1xf32>,
    %c256_i32_27 = arith.constant 256 : i32
    %50 = arith.muli %arg1, %c256_i32_27 : i32
    %c200_i32 = arith.constant 200 : i32
    %51 = arith.subi %c200_i32, %50 : i32
    %52 = vector.broadcast %51 : i32 to vector<1x256xi32>
    %53 = arith.cmpi sge, %29, %52 : vector<1x256xi32>
    %54 = vector.broadcast %53 : vector<1x256xi1> to vector<32x256xi1>
    %55 = arith.ori %35, %54 : vector<32x256xi1>
    %cst_28 = arith.constant 0xFF800000 : f32
    %56 = vector.broadcast %cst_28 : f32 to vector<32x256xf32>
    %57 = arith.select %55, %56, %7 : vector<32x256xi1>, vector<32x256xf32>
    %c0_29 = arith.constant 0 : index
    %c0_30 = arith.constant 0 : index
    %58 = vector.load %arg8[%c0_29, %c0_30] : memref<32x1xf32, #tpu.memory_space<vmem>>, vector<32x1xf32>
    %cst_31 = arith.constant dense<0xFF800000> : vector<32xf32>
    %59 = vector.multi_reduction <maximumf>, %57, %cst_31 [1] : vector<32x256xf32> to vector<32xf32>
    %60 = vector.shape_cast %59 : vector<32xf32> to vector<32x1xf32>
    %61 = arith.maximumf %58, %60 : vector<32x1xf32>
    %c0_32 = arith.constant 0 : index
    %c0_33 = arith.constant 0 : index
    %62 = vector.load %arg8[%c0_32, %c0_33] : memref<32x1xf32, #tpu.memory_space<vmem>>, vector<32x1xf32>
    tpu.vector_store %arg8[%c0_32, %c0_33], %61 {strides = array<i32>} : memref<32x1xf32, #tpu.memory_space<vmem>>, vector<32x1xf32>,
    %c0_i32_34 = arith.constant 0 : i32
    %63 = arith.cmpi eq, %arg1, %c0_i32_34 : i32
    %64 = arith.extui %63 : i1 to i32
    %c0_i32_35 = arith.constant 0 : i32
    %65 = arith.cmpi ne, %64, %c0_i32_35 : i32
    scf.if %65 {
      %c0_36 = arith.constant 0 : index
      %c0_37 = arith.constant 0 : index
      %66 = vector.load %arg9[%c0_36, %c0_37] : memref<32x1xf32, #tpu.memory_space<vmem>>, vector<32x1xf32>
      %cst_38 = arith.constant 5.000000e-01 : f32
      %67 = vector.broadcast %cst_38 : f32 to vector<32x1xf32>
      %68 = arith.mulf %66, %67 : vector<32x1xf32>
      %cst_39 = arith.constant 5.000000e-01 : f32
      %69 = vector.broadcast %cst_39 : f32 to vector<32x1xf32>
      %70 = arith.addf %68, %69 : vector<32x1xf32>
      %71 = arith.mulf %70, %70 : vector<32x1xf32>
      %72 = arith.mulf %70, %71 : vector<32x1xf32>
      %cst_40 = arith.constant 2.000000e+00 : f32
      %73 = vector.broadcast %cst_40 : f32 to vector<32x1xf32>
      %74 = arith.mulf %73, %72 : vector<32x1xf32>
      %cst_41 = arith.constant 1.000000e+00 : f32
      %75 = vector.broadcast %cst_41 : f32 to vector<32x1xf32>
      %76 = arith.subf %74, %75 : vector<32x1xf32>
      %cst_42 = arith.constant 2.000000e-01 : f32
      %77 = vector.broadcast %cst_42 : f32 to vector<32x1xf32>
      %78 = arith.subf %76, %77 : vector<32x1xf32>
      %cst_43 = arith.constant 3.200000e+01 : f32
      %79 = vector.broadcast %cst_43 : f32 to vector<32x1xf32>
      %80 = arith.mulf %79, %78 : vector<32x1xf32>
      %81 = vector.broadcast %6 : f32 to vector<32x1xf32>
      %82 = arith.addf %80, %81 : vector<32x1xf32>
      %cst_44 = arith.constant 0.000000e+00 : f32
      %83 = vector.broadcast %cst_44 : f32 to vector<32x1xf32>
      %84 = arith.subf %83, %82 : vector<32x1xf32>
      %cst_45 = arith.constant 0.000000e+00 : f32
      %85 = vector.broadcast %cst_45 : f32 to vector<32x1xf32>
      %86 = arith.maximumf %84, %85 : vector<32x1xf32>
      %87 = math.absf %84 : vector<32x1xf32>
      %cst_46 = arith.constant 0.000000e+00 : f32
      %88 = vector.broadcast %cst_46 : f32 to vector<32x1xf32>
      %89 = arith.subf %88, %87 : vector<32x1xf32>
      %90 = math.exp %89 : vector<32x1xf32>
      %cst_47 = arith.constant 1.000000e+00 : f32
      %91 = vector.broadcast %cst_47 : f32 to vector<32x1xf32>
      %92 = arith.addf %91, %90 : vector<32x1xf32>
      %93 = math.log %92 : vector<32x1xf32>
      %94 = arith.addf %86, %93 : vector<32x1xf32>
      %cst_48 = arith.constant 2.000000e-01 : f32
      %95 = vector.broadcast %cst_48 : f32 to vector<32x1xf32>
      %96 = arith.addf %76, %95 : vector<32x1xf32>
      %cst_49 = arith.constant 3.200000e+01 : f32
      %97 = vector.broadcast %cst_49 : f32 to vector<32x1xf32>
      %98 = arith.mulf %97, %96 : vector<32x1xf32>
      %99 = vector.broadcast %6 : f32 to vector<32x1xf32>
      %100 = arith.addf %98, %99 : vector<32x1xf32>
      %cst_50 = arith.constant 0.000000e+00 : f32
      %101 = vector.broadcast %cst_50 : f32 to vector<32x1xf32>
      %102 = arith.maximumf %100, %101 : vector<32x1xf32>
      %103 = math.absf %100 : vector<32x1xf32>
      %cst_51 = arith.constant 0.000000e+00 : f32
      %104 = vector.broadcast %cst_51 : f32 to vector<32x1xf32>
      %105 = arith.subf %104, %103 : vector<32x1xf32>
      %106 = math.exp %105 : vector<32x1xf32>
      %cst_52 = arith.constant 1.000000e+00 : f32
      %107 = vector.broadcast %cst_52 : f32 to vector<32x1xf32>
      %108 = arith.addf %107, %106 : vector<32x1xf32>
      %109 = math.log %108 : vector<32x1xf32>
      %110 = arith.addf %102, %109 : vector<32x1xf32>
      %c0_53 = arith.constant 0 : index
      %c0_54 = arith.constant 0 : index
      %111 = vector.load %arg6[%c0_53, %c0_54] : memref<32x1xf32, #tpu.memory_space<vmem>>, vector<32x1xf32>
      %cst_55 = arith.constant 0.699999988 : f32
      %112 = vector.broadcast %cst_55 : f32 to vector<32x1xf32>
      %113 = arith.mulf %112, %94 : vector<32x1xf32>
      %cst_56 = arith.constant 3.000000e-01 : f32
      %114 = vector.broadcast %cst_56 : f32 to vector<32x1xf32>
      %115 = arith.mulf %114, %110 : vector<32x1xf32>
      %116 = arith.subf %113, %115 : vector<32x1xf32>
      %117 = arith.addf %111, %116 : vector<32x1xf32>
      %c0_57 = arith.constant 0 : index
      %c0_58 = arith.constant 0 : index
      %118 = vector.load %arg6[%c0_57, %c0_58] : memref<32x1xf32, #tpu.memory_space<vmem>>, vector<32x1xf32>
      tpu.vector_store %arg6[%c0_57, %c0_58], %117 {strides = array<i32>} : memref<32x1xf32, #tpu.memory_space<vmem>>, vector<32x1xf32>,
      %cst_59 = arith.constant 2.000000e-01 : f32
      %119 = vector.broadcast %cst_59 : f32 to vector<32x1xf32>
      %120 = arith.subf %66, %119 : vector<32x1xf32>
      %c0_60 = arith.constant 0 : index
      %c0_61 = arith.constant 0 : index
      %121 = vector.load %arg8[%c0_60, %c0_61] : memref<32x1xf32, #tpu.memory_space<vmem>>, vector<32x1xf32>
      %122 = arith.cmpf oge, %120, %121 : vector<32x1xf32>
      %123 = arith.extui %122 : vector<32x1xi1> to vector<32x1xi32>
      %124 = arith.sitofp %123 : vector<32x1xi32> to vector<32x1xf32>
      %c0_62 = arith.constant 0 : index
      %c0_63 = arith.constant 0 : index
      %125 = vector.load %arg7[%c0_62, %c0_63] : memref<32x1xf32, #tpu.memory_space<vmem>>, vector<32x1xf32>
      tpu.vector_store %arg7[%c0_62, %c0_63], %124 {strides = array<i32>} : memref<32x1xf32, #tpu.memory_space<vmem>>, vector<32x1xf32>,
    } else {
    }
    return
  }
  func.func @transform_0(%arg0: i32, %arg1: i32) -> (i32, i32) {
    %c0_i32 = arith.constant 0 : i32
    %c0_i32_0 = arith.constant 0 : i32
    return %arg0, %c0_i32 : i32, i32
  }
  func.func @transform_1(%arg0: i32, %arg1: i32) -> (i32, i32) {
    %c0_i32 = arith.constant 0 : i32
    %c0_i32_0 = arith.constant 0 : i32
    return %c0_i32, %arg1 : i32, i32
  }
  func.func @transform_2(%arg0: i32, %arg1: i32) -> (i32, i32) {
    %c0_i32 = arith.constant 0 : i32
    %c0_i32_0 = arith.constant 0 : i32
    return %arg0, %c0_i32 : i32, i32
  }
  func.func @transform_3(%arg0: i32, %arg1: i32) -> (i32, i32) {
    %c0_i32 = arith.constant 0 : i32
    %c0_i32_0 = arith.constant 0 : i32
    %c0_i32_1 = arith.constant 0 : i32
    return %c0_i32, %c0_i32_0 : i32, i32
  }
  func.func @transform_4(%arg0: i32, %arg1: i32) -> (i32, i32) {
    %c0_i32 = arith.constant 0 : i32
    %c0_i32_0 = arith.constant 0 : i32
    return %arg0, %c0_i32 : i32, i32
  }
  func.func @transform_5(%arg0: i32, %arg1: i32) -> (i32, i32) {
    %c0_i32 = arith.constant 0 : i32
    %c0_i32_0 = arith.constant 0 : i32
    return %arg0, %c0_i32 : i32, i32
  }
}

</mosaic_0001>

<bundles_post_ra>
// kernel: tpu_custom_call.1
= control target key start
LH: loop header
LB: loop body
LE: loop exit
PB: predicated region body
PF: predicated region fallthrough
CT: control target
= control target key end

     0   :  { %s1194_s20 = smov 0   ;;  %s1196_s21 = smov 0   ;;  %s1563_s0 = inlined_call_operand.vmem [shape: bf16[64,32], index: 0, kind: input, shape index: {}]   ;;  %s1564_s1 = inlined_call_operand.vmem [shape: bf16[32,256], index: 1, kind: input, shape index: {}]   ;;  %s1565_s2 = inlined_call_operand.vmem [shape: s32[64,1], index: 2, kind: input, shape index: {}]   ;;  %s1566_s3 = inlined_call_operand.<no memory space> [shape: f32[1,1], index: 3, kind: input, shape index: {}]   ;;  %s1567_s4 = inlined_call_operand.vmem [shape: f32[64,1], index: 4, kind: output, shape index: {0}]   ;;  %s1568_s5 = inlined_call_operand.vmem [shape: f32[64,1], index: 5, kind: output, shape index: {1}]  }
   0x1   :  { %11 = sst [smem:[#allocation4]] %s1566_s3  ;;  %s1198_s22 = smov 0  }
   0x2 LB: > { %s29_s3 = sadd.s32 1, %s1152_s21  ;;  %p976_p0 = scmp.ge.s32.totalorder %s1156_s22, 1  ;;  %s1156_s22 = sphi %s1198_s22, %s17_s22   ;;  %s1152_s21 = sphi %s1196_s21, %s1578_s21   ;;  %s1148_s20 = sphi %s1194_s20, %s1577_s20  }
   0x3   : > { %p31_p1 = scmp.ge.s32.totalorder %s29_s3, 2  ;;  %p226_p2 = scmp.lt.s32.totalorder %s1156_s22, 3 }
   0x5   : > { %s1580_s3 = smov (%p31_p1, %s29_s3), 0  ;;  %p227_p3 = pnand %p976_p0, %p226_p2 }
   0x6   : > { %s977_s14 = sshll.u32 (!%p227_p3), %s1148_s20, 2  ;;  %s1249_s25 = sld [smem:[#allocation4]] (!%p227_p3) }
   0x7   : > { %230 = sbr.rel (%p227_p3) target bundleno = 355 (0x163), region = 36  ;;  %p270_p4 = scmp.lt.s32.totalorder (!%p227_p3), %s977_s14, 7 }
   0xc   : > { %v1003_v0 = vld [vmem:[%s1564_s1 + $0x10] sm:$0xf]  ;;  %v1036_v1 = vld [vmem:[%s1564_s1 + $0x14] sm:$0xf0]  ;;  %v1035_v2 = vld [vmem:[%s1564_s1 + $0x14] sm:$0xf]  ;;  %v527_v19 = vlaneseq }
   0xd   : > { %v1004_v3 = vor.u32 %v1036_v1, %v1003_v0  ;;  %v1005_v4 = vld [vmem:[%s1564_s1 + $0x18] sm:$0xf0]  ;;  %v995_v5 = vld [vmem:[%s1564_s1] sm:$0xf]  ;;  %v1034_v6 = vld [vmem:[%s1564_s1 + $0x4] sm:$0xf0] }
   0xe   : > { %v1008_v7 = vor.u32 %v1035_v2, %v1005_v4  ;;  %v1033_v8 = vld [vmem:[%s1564_s1 + $0x4] sm:$0xf]  ;;  %v997_v9 = vld [vmem:[%s1564_s1 + $0x8] sm:$0xf0]  ;;  %v996_v10 = vor.u32 %v1034_v6, %v995_v5  ;;  %s1582_s14 = smov (!%p270_p4, %s977_s14), 7  ;;  %v1158_v12 = vmov 0  }
   0xf   : > { %373 = vmatpush.bf16.msra.mxu0 %v1004_v3  ;;  %1037 = vmatpush.bf16.msra.mxu2 %v1004_v3  ;;  %v1000_v11 = vor.u32 %v1033_v8, %v997_v9  ;;  %s978_s15 = sshll.u32 %s1582_s14, 2  ;;  %s1236_s16 = sshll.u32 %s1582_s14, 3  ;;  %vm360_vm0 = vcmask 261120   ;;  %v1245_v20 = vand.u32 127, %v527_v19  ;;  %vm304_vm14 = vcmask 7168  }
  0x10   : > { %392 = vmatpush.bf16.msra.mxu1 %v1008_v7  ;;  %1039 = vmatpush.bf16.msra.mxu3 %v1008_v7  ;;  %s273_s19 = scalar_lea.vmem %s1563_s0, %s978_s15  ;;  %s285_s24 = scalar_lea.vmem %s1565_s2, %s1236_s16 }
  0x11   : > { %1068 = vset.pattern.permute.xlu0 %v1158_v12  ;;  %1069 = vset.pattern.permute.xlu1 %v1158_v12  ;;  %v1031_v13 = vld [vmem:[%s273_s19] sm:$0xff]  ;;  %v1032_v14 = vld [vmem:[%s273_s19 + $0x8] sm:$0xff]  ;;  %v327_v16 = vld [vmem:[%s285_s24 + $0x10] sm:$0xff]  ;;  %v1252_v23 = vadd.s32 128, %v1245_v20  ;;  %s445_s26 = sadd.f32 -25.6, %s1249_s25  ;;  %s1401_s29 = scalar_lea.vmem %s1567_s4, %s1236_s16 }
  0x12   : > { %v325_v15 = vld [vmem:[%s285_s24] sm:$0xff]  ;;  %543 = vperm.xlu1 %1069, %v327_v16   ;;  %v326_v17 = vld [vmem:[%s285_s24 + $0x8] sm:$0xff]  ;;  %v328_v18 = vld [vmem:[%s285_s24 + $0x18] sm:$0xff]  ;;  %s1465_s7 = scalar_lea.vmem %s1568_s5, %s1236_s16 }
  0x13   : > { %374 = vmatpush.bf16.msra.mxu0 %v996_v10  ;;  %1038 = vmatpush.bf16.msra.mxu2 %v996_v10  ;;  %vm620_vm6 = vcmp.ge.s32.totalorder %v1252_v23, 200  ;;  %v1274_v38 = vstv %s445_s26 }
  0x14   : > { %393 = vmatpush.bf16.msra.mxu1 %v1000_v11  ;;  %1040 = vmatpush.bf16.msra.mxu3 %v1000_v11 }
  0x15   : > { %537 = vperm.xlu0 %1068, %v325_v15  }
  0x16   : > { %1009 = vmatmul.msk.bf16.vlgmr.msra.gmra.mxu0 %vm360_vm0, %v1031_v13  ;;  %1010 = vmatmul.msk.bf16.vlgmr.msra.gmra.mxu2 %vm360_vm0, %v1032_v14 }
  0x17   : > { %1011 = vmatmul.msk.bf16.vlgmr.msra.gmra.mxu1 %vm360_vm0, %v1031_v13  ;;  %1012 = vmatmul.msk.bf16.vlgmr.msra.gmra.mxu3 %vm360_vm0, %v1032_v14 }
  0x1a   : > { %546 = vperm.xlu1 %1069, %v328_v18  }
  0x1d   : > { %540 = vperm.xlu0 %1068, %v326_v17  }
  0x84   : > { %v1247_v22 = vpop.permute.xlu1 %543 }
  0x85   : > { %vm552_vm3 = vcmp.eq.s32.totalorder %v1245_v20, %v1247_v22  ;;  %vm553_vm4 = vcmp.eq.s32.totalorder %v1252_v23, %v1247_v22 }
  0x86   : > { %vm1316_vm12 = vmor %vm553_vm4, %vm620_vm6 }
  0x87   : > { %v538_v21 = vpop.permute.xlu0 %537 }
  0x88   : > { %vm548_vm1 = vcmp.eq.s32.totalorder %v1245_v20, %v538_v21  ;;  %vm549_vm2 = vcmp.eq.s32.totalorder %v1252_v23, %v538_v21 }
  0x89   : > { %vm1302_vm11 = vmor %vm549_vm2, %vm620_vm6 }
  0x8c   : > { %v1265_v34 = vpop.permute.xlu1 %546 }
  0x8d   : > { %vm554_vm8 = vcmp.eq.s32.totalorder %v1245_v20, %v1265_v34  ;;  %vm555_vm9 = vcmp.eq.s32.totalorder %v1252_v23, %v1265_v34 }
  0x8e   : > { %vm1359_vm13 = vmor %vm555_vm9, %vm620_vm6 }
  0x8f   : > { %v541_v30 = vpop.permute.xlu0 %540 }
  0x90   : > { %vm551_vm5 = vcmp.eq.s32.totalorder %v1252_v23, %v541_v30  ;;  %vm550_vm7 = vcmp.eq.s32.totalorder %v1245_v20, %v541_v30 }
  0x91   : > { %vm1284_vm10 = vmor %vm551_vm5, %vm620_vm6 }
  0x93   : > { %v376_v24 = vpop.f32.mrf.mxu0 }
  0x94   : > { %v405_v25 = vmul.f32 0.5, %v376_v24  ;;  %v1256_v26 = vpop.f32.mrf.mxu1  ;;  %v589_v27 = vsel %vm548_vm1, %v376_v24, 0.0  ;;  %v633_v5 = vsel %vm548_vm1, -inf, %v376_v24 }
  0x95   : > { %v406_v28 = vmul.f32 0.5, %v1256_v26  ;;  %v590_v29 = vsel %vm549_vm2, %v1256_v26, 0.0  ;;  %v634_v6 = vsel %vm1302_vm11, -inf, %v1256_v26 }
  0x96   : > { %v413_v31 = vadd.f32 0.5, %v405_v25  ;;  %v597_v32 = vadd.f32 %v590_v29, %v589_v27 }
  0x97   : > { %v414_v33 = vadd.f32 0.5, %v406_v28 }
  0x98   : > { %v421_v35 = vmul.f32 %v413_v31, %v413_v31  ;;  %598 = vadd.xlane.f32.xlu2 %v597_v32 }
  0x99   : > { %v422_v36 = vmul.f32 %v414_v33, %v414_v33  ;;  %v381_v37 = vpop.f32.mrf.mxu2 }
  0x9a   : > { %v429_v39 = vmul.f32 %v421_v35, %v413_v31  ;;  %v409_v40 = vmul.f32 0.5, %v381_v37  ;;  %v400_v41 = vpop.f32.mrf.mxu3  ;;  %v593_v46 = vsel %vm552_vm3, %v381_v37, 0.0  ;;  %v637_v10 = vsel %vm552_vm3, -inf, %v381_v37 }
  0x9b   : > { %v430_v42 = vmul.f32 %v422_v36, %v414_v33  ;;  %v410_v43 = vmul.f32 0.5, %v400_v41  ;;  %v378_v44 = vpop.f32.mrf.mxu0  ;;  %v594_v47 = vsel %vm553_vm4, %v400_v41, 0.0  ;;  %v638_v11 = vsel %vm1316_vm12, -inf, %v400_v41 }
  0x9c   : > { %v437_v48 = vmul.f32 64.0, %v429_v39  ;;  %v417_v49 = vadd.f32 0.5, %v409_v40  ;;  %v407_v50 = vmul.f32 0.5, %v378_v44  ;;  %v591_v51 = vsel %vm550_vm7, %v378_v44, 0.0  ;;  %v1296_v52 = vpop.f32.mrf.mxu1 }
  0x9d   : > { %v438_v54 = vmul.f32 64.0, %v430_v42  ;;  %v418_v55 = vadd.f32 0.5, %v410_v43  ;;  %v1308_v56 = vsel %vm550_vm7, -inf, %v378_v44  ;;  %v408_v57 = vmul.f32 0.5, %v1296_v52 }
  0x9e   : > { %v425_v59 = vmul.f32 %v417_v49, %v417_v49  ;;  %v415_v60 = vadd.f32 0.5, %v407_v50  ;;  %v592_v61 = vsel %vm551_vm5, %v1296_v52, 0.0  ;;  %v636_v62 = vsel %vm1284_vm10, -inf, %v1296_v52 }
  0x9f   : > { %v426_v63 = vmul.f32 %v418_v55, %v418_v55  ;;  %v416_v0 = vadd.f32 0.5, %v408_v57  ;;  %v603_v1 = vadd.f32 %v594_v47, %v593_v46  ;;  %v600_v2 = vadd.f32 %v592_v61, %v591_v51 }
  0xa0   : > { %v433_v3 = vmul.f32 %v425_v59, %v417_v49  ;;  %v423_v4 = vmul.f32 %v415_v60, %v415_v60  ;;  %v1340_v16 = vadd.f32 %v1274_v38, %v437_v48  ;;  %v1343_v21 = vadd.f32 %v1274_v38, %v438_v54 }
  0xa1   : > { %v434_v7 = vmul.f32 %v426_v63, %v418_v55  ;;  %v424_v8 = vmul.f32 %v416_v0, %v416_v0  ;;  %604 = vadd.xlane.f32.xlu0 %v603_v1  ;;  %601 = vadd.xlane.f32.xlu2 %v600_v2  ;;  %v383_v9 = vpop.f32.mrf.mxu2  ;;  %v651_v32 = vmax.f32 %v637_v10, %v638_v11 }
  0xa2   : > { %v431_v12 = vmul.f32 %v423_v4, %v415_v60  ;;  %v411_v13 = vmul.f32 0.5, %v383_v9  ;;  %v595_v14 = vsel %vm554_vm8, %v383_v9, 0.0  ;;  %v402_v15 = vpop.f32.mrf.mxu3  ;;  %v441_v17 = vmul.f32 64.0, %v433_v3 }
  0xa3   : > { %v432_v18 = vmul.f32 %v424_v8, %v416_v0  ;;  %v412_v19 = vmul.f32 0.5, %v402_v15  ;;  %v442_v22 = vmul.f32 64.0, %v434_v7  ;;  %v596_v26 = vsel %vm555_vm9, %v402_v15, 0.0 }
  0xa4   : > { %v439_v24 = vmul.f32 64.0, %v431_v12  ;;  %v419_v25 = vadd.f32 0.5, %v411_v13  ;;  %v606_v29 = vadd.f32 %v596_v26, %v595_v14  ;;  %v645_v33 = vmax.f32 %v633_v5, %v634_v6 }
  0xa5   : > { %v440_v27 = vmul.f32 64.0, %v432_v18  ;;  %v420_v28 = vadd.f32 0.5, %v412_v19  ;;  %v463_v39 = vand.u32 2147483647, %v1340_v16  ;;  %v464_v40 = vand.u32 2147483647, %v1343_v21 }
  0xa6   : > { %v1349_v30 = vadd.f32 %v1274_v38, %v439_v24  ;;  %v427_v31 = vmul.f32 %v419_v25, %v419_v25  ;;  %607 = vadd.xlane.f32.xlu1 %v606_v29  ;;  %v1367_v43 = vadd.f32 %v1274_v38, %v441_v17  ;;  %v1370_v44 = vadd.f32 %v1274_v38, %v442_v22 }
  0xa7   : > { %v1352_v35 = vadd.f32 %v1274_v38, %v440_v27  ;;  %v428_v36 = vmul.f32 %v420_v28, %v420_v28  ;;  %v471_v47 = vsub.f32 0.0, %v463_v39  ;;  %v472_v48 = vsub.f32 0.0, %v464_v40 }
  0xa8   : > { %v465_v41 = vand.u32 2147483647, %v1349_v30  ;;  %v435_v42 = vmul.f32 %v427_v31, %v419_v25  ;;  %v639_v51 = vsel %vm554_vm8, -inf, %v383_v9  ;;  %v640_v53 = vsel %vm1359_vm13, -inf, %v402_v15 }
  0xa9   : > { %v466_v23 = vand.u32 2147483647, %v1352_v35  ;;  %v436_v46 = vmul.f32 %v428_v36, %v420_v28  ;;  %652 = vmax.xlane.f32.xlu0 %v651_v32  ;;  %646 = vmax.xlane.f32.xlu2 %v645_v33  ;;  %v479_v55 = vmul.f32 1.442695, %v471_v47  ;;  %v481_v57 = vmul.f32 1.442695, %v472_v48 }
  0xaa   : > { %v473_v49 = vsub.f32 0.0, %v465_v41  ;;  %v443_v50 = vmul.f32 64.0, %v435_v42  ;;  %v467_v60 = vand.u32 2147483647, %v1367_v43  ;;  %v468_v61 = vand.u32 2147483647, %v1370_v44 }
  0xab   : > { %v444_v54 = vmul.f32 64.0, %v436_v46  ;;  %v474_v58 = vsub.f32 0.0, %v466_v23  ;;  %v654_v20 = vmax.f32 %v639_v51, %v640_v53  ;;  %1070 = vpow2.f32 %v479_v55 }
  0xac   : > { %v1379_v59 = vadd.f32 %v1274_v38, %v443_v50  ;;  %v483_v63 = vmul.f32 1.442695, %v473_v49  ;;  %1072 = vpow2.f32 %v481_v57  ;;  %v475_v1 = vsub.f32 0.0, %v467_v60 }
  0xad   : > { %v1384_v0 = vadd.f32 %v1274_v38, %v444_v54  ;;  %v476_v2 = vsub.f32 0.0, %v468_v61  ;;  %v485_v4 = vmul.f32 1.442695, %v474_v58  ;;  %v1393_v38 = vmax.f32 %v1308_v56, %v636_v62 }
  0xae   : > { %v469_v34 = vand.u32 2147483647, %v1379_v59  ;;  %655 = vmax.xlane.f32.xlu1 %v654_v20  ;;  %v487_v5 = vmul.f32 1.442695, %v475_v1  ;;  %1074 = vpow2.f32 %v483_v63  ;;  %v455_v24 = vmax.f32 %v1340_v16, 0.0 }
  0xaf   : > { %v470_v3 = vand.u32 2147483647, %v1384_v0  ;;  %v489_v6 = vmul.f32 1.442695, %v476_v2  ;;  %v456_v27 = vmax.f32 %v1343_v21, 0.0  ;;  %v459_v16 = vmax.f32 %v1367_v43, 0.0 }
  0xb0   : > { %v477_v7 = vsub.f32 0.0, %v469_v34  ;;  %1076 = vpow2.f32 %v487_v5  ;;  %v460_v21 = vmax.f32 %v1370_v44, 0.0  ;;  %v1159_v49 = vmov 0.0  }
  0xb1   : > { %v478_v8 = vsub.f32 0.0, %v470_v3  ;;  %v1071_v9 = vpop.eup %1070  ;;  %1078 = vpow2.f32 %v489_v6  ;;  %313 = vst.msk [vmem:[#allocation3] sm:$0xff] %vm304_vm14, %v1159_v49  ;;  %v457_v53 = vmax.f32 %v1349_v30, 0.0  ;;  %v458_v54 = vmax.f32 %v1352_v35, 0.0 }
  0xb2   : > { %v1073_v10 = vpop.eup %1072  ;;  %v495_v11 = vadd.f32 1.0, %v1071_v9  ;;  %1080 = vpow2.f32 %v485_v4  ;;  %v491_v12 = vmul.f32 1.442695, %v477_v7  ;;  %305 = vst.msk [vmem:[%s1401_s29] sm:$0xff] %vm304_vm14, %v1159_v49  ;;  %v461_v34 = vmax.f32 %v1379_v59, 0.0 }
  0xb3   : > { %v496_v13 = vadd.f32 1.0, %v1073_v10  ;;  %v493_v14 = vmul.f32 1.442695, %v478_v8  ;;  %314 = vst.msk [vmem:[#allocation3 + $0x8] sm:$0xff] %vm304_vm14, %v1159_v49  ;;  %v462_v30 = vmax.f32 %v1384_v0, 0.0  ;;  %v1160_v3 = vmov -inf  }
  0xb4   : > { %1082 = vlog2.f32 %v495_v11  ;;  %v1075_v15 = vpop.eup %1074  ;;  %315 = vst.msk [vmem:[#allocation3 + $0x10] sm:$0xff] %vm304_vm14, %v1159_v49 }
  0xb5   : > { %1084 = vlog2.f32 %v496_v13  ;;  %v497_v19 = vadd.f32 1.0, %v1075_v15  ;;  %316 = vst.msk [vmem:[#allocation3 + $0x18] sm:$0xff] %vm304_vm14, %v1159_v49 }
  0xb6   : > { %v1077_v17 = vpop.eup %1076  ;;  %1086 = vpow2.f32 %v491_v12  ;;  %306 = vst.msk [vmem:[%s1401_s29 + $0x8] sm:$0xff] %vm304_vm14, %v1159_v49 }
  0xb7   : > { %v1079_v45 = vpop.eup %1078  ;;  %v499_v18 = vadd.f32 1.0, %v1077_v17  ;;  %1088 = vpow2.f32 %v493_v14  ;;  %307 = vst.msk [vmem:[%s1401_s29 + $0x10] sm:$0xff] %vm304_vm14, %v1159_v49 }
  0xb8   : > { %v1081_v52 = vpop.eup %1080  ;;  %v500_v56 = vadd.f32 1.0, %v1079_v45  ;;  %308 = vst.msk [vmem:[%s1401_s29 + $0x18] sm:$0xff] %vm304_vm14, %v1159_v49  ;;  %v585_v4 = vld [vmem:[#allocation3] sm:$0xff] }
  0xb9   : > { %1090 = vlog2.f32 %v499_v18  ;;  %v498_v26 = vadd.f32 1.0, %v1081_v52  ;;  %311 = vst.msk [vmem:[#allocation2 + $0x10] sm:$0xff] %vm304_vm14, %v1160_v3 }
  0xba   : > { %v1083_v62 = vpop.eup %1082  ;;  %1092 = vlog2.f32 %v500_v56  ;;  %309 = vst.msk [vmem:[#allocation2] sm:$0xff] %vm304_vm14, %v1160_v3  ;;  %v586_v6 = vld [vmem:[#allocation3 + $0x8] sm:$0xff] }
  0xbb   : > { %v1085_v22 = vpop.eup %1084  ;;  %v504_v25 = vmul.f32 0.6931472, %v1083_v62  ;;  %1094 = vlog2.f32 %v497_v19  ;;  %310 = vst.msk [vmem:[#allocation2 + $0x8] sm:$0xff] %vm304_vm14, %v1160_v3  ;;  %v587_v0 = vld [vmem:[#allocation3 + $0x10] sm:$0xff] }
  0xbc   : > { %v506_v28 = vmul.f32 0.6931472, %v1085_v22  ;;  %v1087_v29 = vpop.eup %1086  ;;  %1096 = vlog2.f32 %v498_v26  ;;  %312 = vst.msk [vmem:[#allocation2 + $0x18] sm:$0xff] %vm304_vm14, %v1160_v3  ;;  %v588_v13 = vld [vmem:[#allocation3 + $0x18] sm:$0xff] }
  0xbd   : > { %v519_v31 = vadd.f32 %v504_v25, %v455_v24  ;;  %v1089_v32 = vpop.eup %1088  ;;  %v501_v42 = vadd.f32 1.0, %v1087_v29 }
  0xbe   : > { %v520_v33 = vadd.f32 %v506_v28, %v456_v27  ;;  %v502_v23 = vadd.f32 1.0, %v1089_v32 }
  0xbf   : > { %v1091_v36 = vpop.eup %1090  ;;  %1098 = vlog2.f32 %v501_v42 }
  0xc0   : > { %v1093_v37 = vpop.eup %1092  ;;  %v560_v39 = vadd.f32 %v520_v33, %v519_v31  ;;  %v512_v40 = vmul.f32 0.6931472, %v1091_v36  ;;  %1100 = vlog2.f32 %v502_v23  ;;  %v643_v15 = vld [vmem:[#allocation2 + $0x10] sm:$0xff] }
  0xc1   : > { %v514_v41 = vmul.f32 0.6931472, %v1093_v37  ;;  %v1095_v46 = vpop.eup %1094  ;;  %v641_v45 = vld [vmem:[#allocation2] sm:$0xff] }
  0xc2   : > { %561 = vadd.xlane.f32.xlu2 %v560_v39  ;;  %v523_v47 = vadd.f32 %v512_v40, %v459_v16  ;;  %v1097_v50 = vpop.eup %1096  ;;  %v508_v44 = vmul.f32 0.6931472, %v1095_v46  ;;  %v1447_v40 = vstv %s1249_s25 }
  0xc3   : > { %v524_v48 = vadd.f32 %v514_v41, %v460_v21  ;;  %v510_v51 = vmul.f32 0.6931472, %v1097_v50  ;;  %v644_v31 = vld [vmem:[#allocation2 + $0x18] sm:$0xff] }
  0xc4   : > { %v521_v57 = vadd.f32 %v508_v44, %v457_v53 }
  0xc5   : > { %v566_v43 = vadd.f32 %v524_v48, %v523_v47  ;;  %v1099_v55 = vpop.eup %1098  ;;  %v522_v58 = vadd.f32 %v510_v51, %v458_v54 }
  0xc6   : > { %v1101_v60 = vpop.eup %1100  ;;  %v516_v63 = vmul.f32 0.6931472, %v1099_v55 }
  0xc7   : > { %v563_v61 = vadd.f32 %v522_v58, %v521_v57  ;;  %v518_v20 = vmul.f32 0.6931472, %v1101_v60 }
  0xc8   : > { %v525_v1 = vadd.f32 %v516_v63, %v461_v34 }
  0xc9   : > { %v526_v35 = vadd.f32 %v518_v20, %v462_v30 }
  0xca   : > { %567 = vadd.xlane.f32.xlu2 %v566_v43 }
  0xcb   : > { %v569_v2 = vadd.f32 %v526_v35, %v525_v1 }
  0xd2   : > { %564 = vadd.xlane.f32.xlu2 %v563_v61 }
  0xda   : > { %570 = vadd.xlane.f32.xlu2 %v569_v2 }
  0xe2   : > { %649 = vmax.xlane.f32.xlu2 %v1393_v38 }
 0x10b   : > { %v599_v5 = vpop.xlane.xlu2 %598 }
 0x10c   : > { %v609_v59 = vadd.f32 %v599_v5, %v585_v4 }
 0x10e   : > { %613 = vst.msk [vmem:[#allocation3] sm:$0xff] %vm304_vm14, %v609_v59 }
 0x114   : > { %v605_v7 = vpop.xlane.xlu0 %604  ;;  %v602_v8 = vpop.xlane.xlu2 %601 }
 0x115   : > { %v668_v9 = vld [vmem:[#allocation3] sm:$0xff]  ;;  %v611_v38 = vadd.f32 %v605_v7, %v587_v0  ;;  %v610_v10 = vadd.f32 %v602_v8, %v586_v6 }
 0x116   : > { %v672_v11 = vmul.f32 0.5, %v668_v9  ;;  %v1021_v51 = vadd.f32 -0.2, %v668_v9 }
 0x117   : > { %615 = vst.msk [vmem:[#allocation3 + $0x10] sm:$0xff] %vm304_vm14, %v611_v38 }
 0x118   : > { %v676_v12 = vadd.f32 0.5, %v672_v11  ;;  %614 = vst.msk [vmem:[#allocation3 + $0x8] sm:$0xff] %vm304_vm14, %v610_v10 }
 0x119   : > { %v608_v17 = vpop.xlane.xlu1 %607 }
 0x11a   : > { %v680_v14 = vmul.f32 %v676_v12, %v676_v12  ;;  %v612_v18 = vadd.f32 %v608_v17, %v588_v13 }
 0x11c   : > { %v684_v52 = vmul.f32 %v680_v14, %v676_v12  ;;  %v653_v56 = vpop.xlane.xlu0 %652  ;;  %v647_v62 = vpop.xlane.xlu2 %646  ;;  %616 = vst.msk [vmem:[#allocation3 + $0x18] sm:$0xff] %vm304_vm14, %v612_v18 }
 0x11d   : > { %v659_v19 = vmax.f32 %v643_v15, %v653_v56  ;;  %v657_v22 = vmax.f32 %v641_v45, %v647_v62 }
 0x11e   : > { %v688_v24 = vmul.f32 2.0, %v684_v52  ;;  %v1438_v25 = vld [vmem:[#allocation3 + $0x10] sm:$0xff] }
 0x11f   : > { %v674_v26 = vmul.f32 0.5, %v1438_v25  ;;  %v1441_v27 = vld [vmem:[#allocation3 + $0x8] sm:$0xff]  ;;  %663 = vst.msk [vmem:[#allocation2 + $0x10] sm:$0xff] %vm304_vm14, %v659_v19 }
 0x120   : > { %v1013_v28 = vadd.f32 -1.0, %v688_v24  ;;  %v673_v29 = vmul.f32 0.5, %v1441_v27  ;;  %661 = vst.msk [vmem:[#allocation2] sm:$0xff] %vm304_vm14, %v657_v22 }
 0x121   : > { %v678_v32 = vadd.f32 0.5, %v674_v26  ;;  %v656_v39 = vpop.xlane.xlu1 %655 }
 0x122   : > { %v1017_v33 = vadd.f32 -0.2, %v1013_v28  ;;  %v749_v36 = vadd.f32 0.2, %v1013_v28  ;;  %v677_v37 = vadd.f32 0.5, %v673_v29  ;;  %v660_v16 = vmax.f32 %v644_v31, %v656_v39 }
 0x123   : > { %v682_v41 = vmul.f32 %v678_v32, %v678_v32  ;;  %v1449_v46 = vld [vmem:[#allocation3 + $0x18] sm:$0xff] }
 0x124   : > { %v700_v21 = vmul.f32 32.0, %v1017_v33  ;;  %v753_v42 = vmul.f32 32.0, %v749_v36  ;;  %v681_v23 = vmul.f32 %v677_v37, %v677_v37  ;;  %v675_v48 = vmul.f32 0.5, %v1449_v46  ;;  %664 = vst.msk [vmem:[#allocation2 + $0x18] sm:$0xff] %vm304_vm14, %v660_v16 }
 0x125   : > { %v686_v47 = vmul.f32 %v682_v41, %v678_v32 }
 0x126   : > { %v1454_v50 = vadd.f32 %v1447_v40, %v700_v21  ;;  %v1457_v43 = vadd.f32 %v753_v42, %v1447_v40  ;;  %v685_v44 = vmul.f32 %v681_v23, %v677_v37  ;;  %v679_v54 = vadd.f32 0.5, %v675_v48  ;;  %v556_v23 = vld [vmem:[%s1401_s29] sm:$0xff] }
 0x127   : > { %v690_v53 = vmul.f32 2.0, %v686_v47  ;;  %v825_v55 = vld [vmem:[#allocation2] sm:$0xff] }
 0x128   : > { %v709_v57 = vsub.f32 0.0, %v1454_v50  ;;  %v765_v58 = vand.u32 2147483647, %v1457_v43  ;;  %v689_v60 = vmul.f32 2.0, %v685_v44  ;;  %v683_v63 = vmul.f32 %v679_v54, %v679_v54 }
 0x129   : > { %v1015_v61 = vadd.f32 -1.0, %v690_v53  ;;  %vm829_vm15 = vcmp.ge.f32.partialorder %v1021_v51, %v825_v55  ;;  %v558_v51 = vld [vmem:[%s1401_s29 + $0x10] sm:$0xff]  ;;  %v557_v53 = vld [vmem:[%s1401_s29 + $0x8] sm:$0xff] }
 0x12a   : > { %v717_v20 = vand.u32 2147483647, %v709_v57  ;;  %v1014_v34 = vadd.f32 -1.0, %v689_v60  ;;  %v687_v35 = vmul.f32 %v683_v63, %v679_v54  ;;  %v1025_v2 = vsel %vm829_vm15, 1.0, %v1159_v49  ;;  %v1506_v54 = vld [vmem:[%s1401_s29 + $0x18] sm:$0xff] }
 0x12b   : > { %v1019_v30 = vadd.f32 -0.2, %v1015_v61  ;;  %v751_v1 = vadd.f32 0.2, %v1015_v61  ;;  %v769_v4 = vsub.f32 0.0, %v765_v58  ;;  %841 = vst.msk [vmem:[%s1465_s7] sm:$0xff] %vm304_vm14, %v1025_v2 }
 0x12c   : > { %v721_v3 = vsub.f32 0.0, %v717_v20  ;;  %v1018_v5 = vadd.f32 -0.2, %v1014_v34  ;;  %v750_v6 = vadd.f32 0.2, %v1014_v34  ;;  %v691_v7 = vmul.f32 2.0, %v687_v35 }
 0x12d   : > { %v702_v59 = vmul.f32 32.0, %v1019_v30  ;;  %v755_v0 = vmul.f32 32.0, %v751_v1  ;;  %v773_v12 = vmul.f32 1.442695, %v769_v4 }
 0x12e   : > { %v701_v8 = vmul.f32 32.0, %v1018_v5  ;;  %v754_v10 = vmul.f32 32.0, %v750_v6  ;;  %v1016_v11 = vadd.f32 -1.0, %v691_v7  ;;  %v725_v14 = vmul.f32 1.442695, %v721_v3 }
 0x12f   : > { %v1473_v9 = vadd.f32 %v1447_v40, %v702_v59  ;;  %v1476_v38 = vadd.f32 %v755_v0, %v1447_v40  ;;  %1102 = vpow2.f32 %v773_v12 }
 0x130   : > { %v1479_v13 = vadd.f32 %v1447_v40, %v701_v8  ;;  %v1484_v45 = vadd.f32 %v754_v10, %v1447_v40  ;;  %v1020_v52 = vadd.f32 -0.2, %v1016_v11  ;;  %v752_v56 = vadd.f32 0.2, %v1016_v11 }
 0x131   : > { %v711_v15 = vsub.f32 0.0, %v1473_v9  ;;  %v767_v17 = vand.u32 2147483647, %v1476_v38  ;;  %1104 = vpow2.f32 %v725_v14 }
 0x132   : > { %v710_v18 = vsub.f32 0.0, %v1479_v13  ;;  %v766_v24 = vand.u32 2147483647, %v1484_v45  ;;  %v703_v26 = vmul.f32 32.0, %v1020_v52  ;;  %v756_v31 = vmul.f32 32.0, %v752_v56 }
 0x133   : > { %v719_v62 = vand.u32 2147483647, %v711_v15  ;;  %v771_v19 = vsub.f32 0.0, %v767_v17 }
 0x134   : > { %v718_v22 = vand.u32 2147483647, %v710_v18  ;;  %v770_v33 = vsub.f32 0.0, %v766_v24  ;;  %v1493_v36 = vadd.f32 %v1447_v40, %v703_v26  ;;  %v1496_v39 = vadd.f32 %v756_v31, %v1447_v40 }
 0x135   : > { %v723_v28 = vsub.f32 0.0, %v719_v62  ;;  %v777_v29 = vmul.f32 1.442695, %v771_v19  ;;  %v562_v41 = vpop.xlane.xlu2 %561  ;;  %v1103_v40 = vpop.eup %1102 }
 0x136   : > { %v722_v32 = vsub.f32 0.0, %v718_v22  ;;  %v775_v21 = vmul.f32 1.442695, %v770_v33  ;;  %v712_v42 = vsub.f32 0.0, %v1493_v36  ;;  %v768_v47 = vand.u32 2147483647, %v1496_v39 }
 0x137   : > { %v729_v37 = vmul.f32 1.442695, %v723_v28  ;;  %1106 = vpow2.f32 %v777_v29  ;;  %v572_v48 = vmul.f32 0.3, %v562_v41  ;;  %v1105_v60 = vpop.eup %1104  ;;  %v781_v34 = vadd.f32 1.0, %v1103_v40 }
 0x138   : > { %v727_v16 = vmul.f32 1.442695, %v722_v32  ;;  %v720_v44 = vand.u32 2147483647, %v712_v42  ;;  %v772_v55 = vsub.f32 0.0, %v768_v47  ;;  %v733_v1 = vadd.f32 1.0, %v1105_v60 }
 0x139   : > { %1108 = vpow2.f32 %v729_v37  ;;  %v576_v58 = vadd.f32 %v572_v48, %v556_v23  ;;  %v761_v32 = vmax.f32 %v1457_v43, 0.0  ;;  %v713_v41 = vmax.f32 %v709_v57, 0.0 }
 0x13a   : > { %1110 = vpow2.f32 %v727_v16  ;;  %v724_v61 = vsub.f32 0.0, %v720_v44  ;;  %v779_v63 = vmul.f32 1.442695, %v772_v55  ;;  %v714_v23 = vmax.f32 %v710_v18, 0.0 }
 0x13b   : > { %1112 = vpow2.f32 %v775_v21  ;;  %581 = vst.msk [vmem:[%s1401_s29] sm:$0xff] %vm304_vm14, %v576_v58  ;;  %v762_v43 = vmax.f32 %v1484_v45, 0.0  ;;  %v716_v40 = vmax.f32 %v712_v42, 0.0  ;;  %v764_v60 = vmax.f32 %v1496_v39, 0.0  ;;  %v642_v45 = vld [vmem:[#allocation2 + $0x8] sm:$0xff] }
 0x13c   : > { %v731_v30 = vmul.f32 1.442695, %v724_v61  ;;  %1114 = vpow2.f32 %v779_v63 }
 0x13d   : > { %v1107_v20 = vpop.eup %1106  ;;  %v568_v35 = vpop.xlane.xlu2 %567 }
 0x13e   : > { %v783_v3 = vadd.f32 1.0, %v1107_v20  ;;  %1116 = vpow2.f32 %v731_v30  ;;  %v574_v12 = vmul.f32 0.3, %v568_v35  ;;  %v763_v20 = vmax.f32 %v1476_v38, 0.0 }
 0x13f   : > { %v1109_v2 = vpop.eup %1108  ;;  %1118 = vlog2.f32 %v781_v34 }
 0x140   : > { %v1111_v4 = vpop.eup %1110  ;;  %v735_v59 = vadd.f32 1.0, %v1109_v2  ;;  %1120 = vlog2.f32 %v733_v1  ;;  %v578_v24 = vadd.f32 %v574_v12, %v558_v51 }
 0x141   : > { %v1113_v5 = vpop.eup %1112  ;;  %v734_v0 = vadd.f32 1.0, %v1111_v4  ;;  %1122 = vlog2.f32 %v783_v3 }
 0x142   : > { %v782_v6 = vadd.f32 1.0, %v1113_v5  ;;  %v1115_v7 = vpop.eup %1114  ;;  %583 = vst.msk [vmem:[%s1401_s29 + $0x10] sm:$0xff] %vm304_vm14, %v578_v24 }
 0x143   : > { %1124 = vlog2.f32 %v734_v0  ;;  %v784_v10 = vadd.f32 1.0, %v1115_v7  ;;  %v797_v0 = vld [vmem:[%s1401_s29] sm:$0xff] }
 0x144   : > { %v1117_v8 = vpop.eup %1116  ;;  %1126 = vlog2.f32 %v735_v59 }
 0x145   : > { %1128 = vlog2.f32 %v782_v6  ;;  %v736_v11 = vadd.f32 1.0, %v1117_v8  ;;  %v565_v14 = vpop.xlane.xlu2 %564  ;;  %v1119_v17 = vpop.eup %1118 }
 0x146   : > { %1130 = vlog2.f32 %v784_v10  ;;  %v573_v52 = vmul.f32 0.3, %v565_v14  ;;  %v1121_v56 = vpop.eup %1120  ;;  %v786_v16 = vmul.f32 0.6931472, %v1119_v17  ;;  %v827_v14 = vld [vmem:[#allocation2 + $0x10] sm:$0xff] }
 0x147   : > { %1132 = vlog2.f32 %v736_v11  ;;  %v1123_v62 = vpop.eup %1122  ;;  %v738_v31 = vmul.f32 0.6931472, %v1121_v56  ;;  %v828_v56 = vld [vmem:[#allocation2 + $0x18] sm:$0xff] }
 0x148   : > { %v577_v19 = vadd.f32 %v573_v52, %v557_v53  ;;  %v715_v53 = vmax.f32 %v711_v15, 0.0  ;;  %v790_v55 = vmul.f32 0.6931472, %v1123_v62  ;;  %v793_v61 = vadd.f32 %v786_v16, %v761_v32 }
 0x149   : > { %v1125_v22 = vpop.eup %1124  ;;  %v745_v57 = vadd.f32 %v738_v31, %v713_v41  ;;  %v799_v7 = vld [vmem:[%s1401_s29 + $0x10] sm:$0xff]  ;;  %v1023_v52 = vadd.f32 -0.2, %v1438_v25 }
 0x14a   : > { %v1127_v26 = vpop.eup %1126  ;;  %582 = vst.msk [vmem:[%s1401_s29 + $0x8] sm:$0xff] %vm304_vm14, %v577_v19  ;;  %v740_v33 = vmul.f32 0.6931472, %v1125_v22  ;;  %v795_v42 = vadd.f32 %v790_v55, %v763_v20  ;;  %v805_v1 = vmul.f32 0.3, %v793_v61 }
 0x14b   : > { %v1129_v28 = vpop.eup %1128  ;;  %v742_v21 = vmul.f32 0.6931472, %v1127_v26  ;;  %v801_v36 = vmul.f32 0.7, %v745_v57  ;;  %v1022_v19 = vadd.f32 -0.2, %v1441_v27  ;;  %vm831_vm0 = vcmp.ge.f32.partialorder %v1023_v52, %v827_v14 }
 0x14c   : > { %v1131_v29 = vpop.eup %1130  ;;  %v788_v48 = vmul.f32 0.6931472, %v1129_v28  ;;  %v746_v58 = vadd.f32 %v740_v33, %v714_v23  ;;  %v807_v3 = vmul.f32 0.3, %v795_v42  ;;  %v1024_v22 = vadd.f32 -0.2, %v1449_v46 }
 0x14d   : > { %v1133_v37 = vpop.eup %1132  ;;  %v571_v47 = vpop.xlane.xlu2 %570  ;;  %v792_v50 = vmul.f32 0.6931472, %v1131_v29  ;;  %v747_v63 = vadd.f32 %v742_v21, %v715_v53  ;;  %v809_v5 = vsub.f32 %v801_v36, %v805_v1  ;;  %v1027_v26 = vsel %vm831_vm0, 1.0, %v1159_v49 }
 0x14e   : > { %v744_v44 = vmul.f32 0.6931472, %v1133_v37  ;;  %v575_v51 = vmul.f32 0.3, %v571_v47  ;;  %v794_v9 = vadd.f32 %v788_v48, %v762_v43  ;;  %v802_v34 = vmul.f32 0.7, %v746_v58 }
 0x14f   : > { %v796_v15 = vadd.f32 %v792_v50, %v764_v60  ;;  %v803_v39 = vmul.f32 0.7, %v747_v63  ;;  %v813_v11 = vadd.f32 %v809_v5, %v797_v0  ;;  %vm832_vm1 = vcmp.ge.f32.partialorder %v1024_v22, %v828_v56  ;;  %843 = vst.msk [vmem:[%s1465_s7 + $0x10] sm:$0xff] %vm304_vm14, %v1027_v26 }
 0x150   : > { %v579_v13 = vadd.f32 %v575_v51, %v1506_v54  ;;  %v748_v18 = vadd.f32 %v744_v44, %v716_v40  ;;  %v806_v35 = vmul.f32 0.3, %v794_v9  ;;  %v1028_v28 = vsel %vm832_vm1, 1.0, %v1159_v49 }
 0x151   : > { %v808_v38 = vmul.f32 0.3, %v796_v15  ;;  %v798_v6 = vld [vmem:[%s1401_s29 + $0x8] sm:$0xff]  ;;  %v811_v8 = vsub.f32 %v803_v39, %v807_v3  ;;  %817 = vst.msk [vmem:[%s1401_s29] sm:$0xff] %vm304_vm14, %v813_v11 }
 0x152   : > { %584 = vst.msk [vmem:[%s1401_s29 + $0x18] sm:$0xff] %vm304_vm14, %v579_v13  ;;  %v804_v30 = vmul.f32 0.7, %v748_v18  ;;  %v810_v4 = vsub.f32 %v802_v34, %v806_v35 }
 0x153   : > { %v815_v17 = vadd.f32 %v811_v8, %v799_v7  ;;  %844 = vst.msk [vmem:[%s1465_s7 + $0x18] sm:$0xff] %vm304_vm14, %v1028_v28 }
 0x154   : > { %v812_v59 = vsub.f32 %v804_v30, %v808_v38  ;;  %v814_v12 = vadd.f32 %v810_v4, %v798_v6 }
 0x155   : > { %v650_v54 = vpop.xlane.xlu2 %649  ;;  %819 = vst.msk [vmem:[%s1401_s29 + $0x10] sm:$0xff] %vm304_vm14, %v815_v17 }
 0x156   : > { %v658_v2 = vmax.f32 %v642_v45, %v650_v54  ;;  %818 = vst.msk [vmem:[%s1401_s29 + $0x8] sm:$0xff] %vm304_vm14, %v814_v12 }
 0x158   : > { %662 = vst.msk [vmem:[#allocation2 + $0x8] sm:$0xff] %vm304_vm14, %v658_v2 }
 0x159   : > { %v800_v10 = vld [vmem:[%s1401_s29 + $0x18] sm:$0xff] }
 0x15a   : > { %v816_v62 = vadd.f32 %v812_v59, %v800_v10 }
 0x15c   : > { %820 = vst.msk [vmem:[%s1401_s29 + $0x18] sm:$0xff] %vm304_vm14, %v816_v62 }
 0x15f   : > { %v826_v24 = vld [vmem:[#allocation2 + $0x8] sm:$0xff] }
 0x160   : > { %vm830_vm2 = vcmp.ge.f32.partialorder %v1022_v19, %v826_v24 }
 0x161   : > { %v1026_v25 = vsel %vm830_vm2, 1.0, %v1159_v49 }
 0x162   : > { %842 = vst.msk [vmem:[%s1465_s7 + $0x8] sm:$0xff] %vm304_vm14, %v1026_v25 }
 0x163 PF: > { %s17_s22 = sadd.s32 1, %s1156_s22   ;;  %s1577_s20 = smov %s1152_s21 }
 0x164   : > { %p14_p5 = scmp.ge.s32.totalorder %s17_s22, 4   ;;  %s1578_s21 = smov %s1580_s3 }
 0x166   :  { %16 = sbr.rel (!%p14_p5) target bundleno = 2 (0x2), region = 92 }

</bundles_post_ra>
